<compile_context>
chip_gen: v7x
topology: tpu7x:2x2x1
jax: 0.10.0
libtpu: 0.0.40
codegen_flags: <defaults>
</compile_context>

<pallas_src>
import numpy as np
import jax
import jax.numpy as jnp
from jax.experimental import pallas as pl
from jax.experimental.pallas import tpu as pltpu


def _round_up(x, m):
    return (x + m - 1) // m * m


_VMEM_CAP_CACHE = [None]


def _vmem_capacity_bytes():
    """Physical VMEM of the attached TPU, used to budget tiles / clamp vmem_limit."""
    if _VMEM_CAP_CACHE[0] is not None:
        return _VMEM_CAP_CACHE[0]
    cap = None
    try:
        cap = int(pltpu.get_tpu_info().vmem_capacity_bytes)
        if cap < 32 * 2**20:
            cap = None
    except Exception:
        cap = None
    try:
        kind = jax.devices()[0].device_kind.lower()
    except Exception:
        kind = ""
    if "v7" in kind:                                 # 64 MiB per TensorCore on v7x
        cap = min(cap or (64 * 2**20), 64 * 2**20)
    if cap is None:
        cap = 128 * 2**20 if any(t in kind for t in ("v4", "v5", "v6")) else 64 * 2**20
    _VMEM_CAP_CACHE[0] = cap
    return cap


def _plan(H_out, Wp, K, Coutp, n_phases, n_qh, halo, apply_silu, tile_rows,
          hoist_weights, vmem_cap):
    """Pick the output-row tile TH and whether the full weight stays VMEM-resident,
    keeping one grid step's (double-buffered) working set under a generation-aware
    budget."""
    big = vmem_cap >= 96 * 2**20
    budget = (48 if big else 22) * 2**20
    target_m = 8192 if big else 2048
    n_taps = n_phases * n_qh
    w_hoist = 2 * n_taps * K * Coutp * 2      # full weight (bf16), x2 buffers
    w_stream = 2 * n_qh * K * Coutp * 2       # one phase's taps (bf16), x2 buffers

    def need(t, wbytes):
        m, p = t * Wp, (t + halo) * Wp
        n = 2 * p * K * 2                                  # input tile (bf16, x2)
        n += wbytes                                        # weight
        n += 2 * Coutp * 4                                 # bias
        n += 2 * m * Coutp * 2                             # feat out (bf16, x2)
        n += (2 * m * Coutp * 2) if apply_silu else 0      # act out (bf16, x2)
        n += (m * Coutp * 4) if n_phases > 1 else 0        # f32 accumulator scratch
        return n

    # Keep the row tile from collapsing relative to the halo (input re-read factor).
    th_floor = max(1, min(H_out, 2 * halo if halo else 1))

    def pick(wbytes):
        if tile_rows is not None:
            return max(1, min(int(tile_rows), H_out))
        t = max(th_floor, min(H_out, max(1, target_m // max(1, Wp))))
        while t > th_floor and need(t, wbytes) > budget:
            t = max(th_floor, t // 2)
        return t

    hoist = hoist_weights
    if hoist is None:
        hoist = (n_phases > 1) and (need(pick(w_hoist), w_hoist) <= budget)
    hoist = bool(hoist) and (n_phases > 1)
    wbytes = w_hoist if hoist else w_stream
    th = pick(wbytes)
    return th, hoist, need(th, wbytes)


def _make_conv_kernel(n_qh, Wp, M, n_phases, apply_silu, hoist_w):
    multi = n_phases > 1

    def kernel(xt_ref, w_ref, b_ref, *refs):
        # xt_ref : (1, 1, P, K)  one H-phase of the im2col'd input tile (bf16)
        # w_ref  : (n_taps, K, Coutp) hoisted full weight | (n_qh, K, Coutp) streamed
        # b_ref  : (1, Coutp) f32
        # outs   : feat (1, M, Coutp) bf16 [, act (1, M, Coutp) bf16]
        # scratch: acc (M, Coutp) f32, only when the phase axis is a grid reduction
        if multi:
            if apply_silu:
                feat_ref, act_ref, acc_ref = refs
            else:
                feat_ref, acc_ref = refs
        else:
            if apply_silu:
                feat_ref, act_ref = refs
            else:
                (feat_ref,) = refs

        r = pl.program_id(1)                       # stride phase == reduction step
        base = r * n_qh if hoist_w else 0          # dynamic tap base into hoisted w

        if multi:
            @pl.when(r == 0)
            def _init():
                acc_ref[...] = jnp.zeros_like(acc_ref)

            for qh in range(n_qh):                 # static unroll over phase taps
                lhs = xt_ref[0, 0, qh * Wp:qh * Wp + M, :]     # sublane-aligned slice
                acc_ref[...] += jnp.dot(lhs, w_ref[base + qh],
                                        preferred_element_type=jnp.float32)

            @pl.when(r == pl.num_programs(1) - 1)
            def _epilogue():
                y = acc_ref[...] + b_ref[...]      # bias broadcast once (f32)
                feat_ref[0] = y.astype(feat_ref.dtype)
                if apply_silu:                     # fused SiLU: f32 math, bf16 store
                    act_ref[0] = (y * jax.nn.sigmoid(y)).astype(act_ref.dtype)
        else:
            acc = None
            for qh in range(n_qh):
                lhs = xt_ref[0, 0, qh * Wp:qh * Wp + M, :]
                d = jnp.dot(lhs, w_ref[base + qh],
                            preferred_element_type=jnp.float32)
                acc = d if acc is None else acc + d
            y = acc + b_ref[...]
            feat_ref[0] = y.astype(feat_ref.dtype)
            if apply_silu:
                act_ref[0] = (y * jax.nn.sigmoid(y)).astype(act_ref.dtype)

    return kernel


def conv2d_pallas(x, w, b, stride, pad, apply_silu, tile_rows=None, hoist_weights=None):
    """PyTorch Conv2d(stride, padding=pad, dilation=1) with an optional fused SiLU.

    x: (B, H, W, Cin) NHWC; w: (KH, KW, Cin, Cout) f32; b: (Cout,) f32
    Returns (feat, act):
      feat: (B, H_out, W_out, Cout) bf16 -- pre-activation (the PyTorch "feature")
      act : (B, H_out, W_out, Cout) bf16 -- SiLU(feat), or None if apply_silu=False
    """
    B, H, W, Cin = x.shape
    KH, KW, _, Cout = w.shape
    sh = sw = int(stride)
    H_out = (H + 2 * pad - KH) // sh + 1
    W_out = (W + 2 * pad - KW) // sw + 1
    Coutp = _round_up(Cout, 128)        # lane-dense output stores
    Wp = _round_up(W_out, 8)            # sublane-aligned per-tap slices & stores
    vmem_cap = _vmem_capacity_bytes()

    # Early layers with a shallow contraction: fold the whole KHxKW window into K so
    # the MXU sees a deep contraction and the phase/tap loops disappear.
    K_poly = KW * Cin
    use_full = (K_poly < 256) and (KH * KW * Cin <= 2048)
    if use_full:
        n_phases, n_qh, halo = 1, 1, 0
        K = KH * KW * Cin
    else:
        n_phases = sh
        halo = (KH - 1) // sh           # extra polyphase rows a tile needs below it
        n_qh = halo + 1                 # taps per H-phase (KH padded to sh*n_qh)
        K = K_poly

    TH, hoist_w, vmem_need = _plan(H_out, Wp, K, Coutp, n_phases, n_qh, halo,
                                   apply_silu, tile_rows, hoist_weights, vmem_cap)
    nT = -(-H_out // TH)
    M = TH * Wp                         # matmul M per tile (multiple of 8)
    P = (TH + halo) * Wp                # input rows per phase per tile (incl. halo)

    xb = x.astype(jnp.bfloat16)

    if use_full:
        # ---- full KHxKW im2col: (B, H_out, W_out, KH*KW*Cin) --------------------
        xp = jnp.pad(xb, ((0, 0), (pad, pad), (pad, pad), (0, 0)))
        rowh = (jnp.arange(H_out)[:, None] * sh + jnp.arange(KH)[None, :]).reshape(-1)
        colw = (jnp.arange(W_out)[:, None] * sw + jnp.arange(KW)[None, :]).reshape(-1)
        xc = jnp.take(jnp.take(xp, rowh, axis=1), colw, axis=2)
        xc = xc.reshape(B, H_out, KH, W_out, KW, Cin)
        xc = xc.transpose(0, 1, 3, 2, 4, 5).reshape(B, H_out, W_out, K)
        xc = jnp.pad(xc, ((0, 0), (0, nT * TH - H_out), (0, Wp - W_out), (0, 0)))
        xt = xc.reshape(B, nT, 1, M, K).reshape(B * nT, 1, M, K)
        wt = jnp.pad(w.reshape(K, Cout), ((0, 0), (0, Coutp - Cout)))
        wt = wt.reshape(1, K, Coutp).astype(jnp.bfloat16)
    else:
        # ---- im2col along W only; H stride removed via polyphase decomposition ---
        xw = jnp.pad(xb, ((0, 0), (0, 0), (pad, pad), (0, 0)))
        colw = (jnp.arange(W_out)[:, None] * sw + jnp.arange(KW)[None, :]).reshape(-1)
        xw = jnp.take(xw, colw, axis=2).reshape(B, H, W_out, K)
        xw = jnp.pad(xw, ((0, 0), (0, 0), (0, Wp - W_out), (0, 0)))
        Hq = H_out + halo
        bot = sh * Hq - H - pad
        xw = jnp.pad(xw, ((0, 0), (pad, max(bot, 0)), (0, 0), (0, 0)))[:, :sh * Hq]
        xph = xw.reshape(B, Hq, sh, Wp, K).transpose(0, 2, 1, 3, 4)   # (B,sh,Hq,Wp,K)
        # overlapped H tiles (halo rows duplicated host-side)
        xph = jnp.pad(xph, ((0, 0), (0, 0), (0, nT * TH - H_out), (0, 0), (0, 0)))
        rows = (jnp.arange(nT)[:, None] * TH
                + jnp.arange(TH + halo)[None, :]).reshape(-1)
        xt = jnp.take(xph, rows, axis=2)
        xt = xt.reshape(B, sh, nT, TH + halo, Wp, K).transpose(0, 2, 1, 3, 4, 5)
        xt = xt.reshape(B * nT, sh, P, K)
        # weight grouped by (phase, tap): flat index r*n_qh + qh == original kh
        wt = w.reshape(KH, K, Cout)
        wt = jnp.pad(wt, ((0, sh * n_qh - KH), (0, 0), (0, Coutp - Cout)))
        wt = wt.reshape(n_qh, sh, K, Coutp).transpose(1, 0, 2, 3)
        wt = wt.reshape(sh * n_qh, K, Coutp).astype(jnp.bfloat16)

    bt = jnp.pad(b.astype(jnp.float32), (0, Coutp - Cout)).reshape(1, Coutp)
    n_taps = wt.shape[0]

    if hoist_w:
        # Full weight resident in VMEM for the whole grid (constant block index):
        # removes the per-phase weight re-DMA (DMA-bound deep layers on v6e/v5e).
        w_spec = pl.BlockSpec((n_taps, K, Coutp), lambda g, r: (0, 0, 0))
    else:
        w_spec = pl.BlockSpec((n_qh, K, Coutp), lambda g, r: (r, 0, 0))

    out_shapes = [jax.ShapeDtypeStruct((B * nT, M, Coutp), jnp.bfloat16)]
    out_specs = [pl.BlockSpec((1, M, Coutp), lambda g, r: (g, 0, 0))]
    if apply_silu:
        out_shapes.append(jax.ShapeDtypeStruct((B * nT, M, Coutp), jnp.bfloat16))
        out_specs.append(pl.BlockSpec((1, M, Coutp), lambda g, r: (g, 0, 0)))

    scratch_shapes = []
    if n_phases > 1:
        # f32 accumulation across the phase (grid-reduction) axis; the bf16 outputs
        # can't hold the partial sums without precision loss.
        scratch_shapes.append(pltpu.VMEM((M, Coutp), jnp.float32))

    # vmem limit: enough for this layer's working set, clamped to physical VMEM.
    vmem_limit = max(32 * 2**20, int(vmem_need) * 5 // 4)
    vmem_limit = int(min(vmem_limit, vmem_cap - 4 * 2**20))

    outs = pl.pallas_call(
        _make_conv_kernel(n_qh, Wp, M, n_phases, apply_silu, hoist_w),
        out_shape=tuple(out_shapes),
        grid=(B * nT, n_phases),
        in_specs=[
            pl.BlockSpec((1, 1, P, K), lambda g, r: (g, r, 0, 0)),
            w_spec,
            pl.BlockSpec((1, Coutp), lambda g, r: (0, 0)),
        ],
        out_specs=tuple(out_specs),
        scratch_shapes=scratch_shapes,
        compiler_params=pltpu.CompilerParams(
            dimension_semantics=("parallel", "arbitrary"),
            vmem_limit_bytes=vmem_limit,
        ),
    )(xt, wt, bt)

    def unpad(o):
        o = o.reshape(B, nT * TH, Wp, Coutp)
        return o[:, :H_out, :W_out, :Cout]

    feat = unpad(outs[0])
    act = unpad(outs[1]) if apply_silu else None
    return feat, act


# --------------------------------------------------------------------------------
# SharedDiscriminatorConvNet (Conv2d variant) parameters / forward
# --------------------------------------------------------------------------------
def init_params(key, in_size, out_size=1, capacity=32, n_layers=4,
                kernel_size=15, stride=4):
    """Parameters matching SharedDiscriminatorConvNet(Conv2d) at init.
    torch.nn.utils.weight_norm is an identity reparameterization at init (g=||v||),
    so the effective weight equals the freshly-initialized weight tensor."""
    # TODO(synk): Conv1d variant, tuple kernel_size and per-layer stride lists are
    #             not implemented (square-kernel Conv2d only).
    channels = [in_size] + [capacity * (2 ** i) for i in range(n_layers)]
    strides = [stride] * n_layers if isinstance(stride, int) else list(stride)
    layers = []
    for i in range(n_layers):
        key, k_w, k_b = jax.random.split(key, 3)
        bound = 1.0 / np.sqrt(channels[i] * kernel_size * kernel_size)
        w = jax.random.uniform(k_w, (kernel_size, kernel_size,
                                     channels[i], channels[i + 1]),
                               jnp.float32, -bound, bound)
        b = jax.random.uniform(k_b, (channels[i + 1],), jnp.float32, -bound, bound)
        layers.append(dict(w=w, b=b, stride=int(strides[i]),
                           pad=kernel_size // 2, silu=True))
    key, k_w, k_b = jax.random.split(key, 3)
    bound = 1.0 / np.sqrt(channels[-1])
    w = jax.random.uniform(k_w, (1, 1, channels[-1], out_size),
                           jnp.float32, -bound, bound)
    b = jax.random.uniform(k_b, (out_size,), jnp.float32, -bound, bound)
    layers.append(dict(w=w, b=b, stride=1, pad=0, silu=False))
    return layers


def shared_conv_net_forward(x, params, tile_rows=None, hoist_weights=None):
    """x: (B, C, H, W) f32 (NCHW). Returns (score (B,), features: list of NCHW f32)."""
    xi = jnp.transpose(x, (0, 2, 3, 1))                      # NHWC for the kernels
    features = []
    for lyr in params:
        KH, KW = lyr["w"].shape[:2]
        if KH == 1 and KW == 1 and lyr["stride"] == 1 and lyr["pad"] == 0:
            # Final 1x1 projection (Cout=1): a padded-to-128 MXU launch would waste
            # 127/128 of the lanes/writeback; XLA handles this tiny layer better.
            w2 = lyr["w"][0, 0].astype(jnp.bfloat16)
            y = jnp.einsum("bhwc,co->bhwo", xi.astype(jnp.bfloat16), w2,
                           preferred_element_type=jnp.float32) + lyr["b"]
            features.append(jnp.transpose(y, (0, 3, 1, 2)))  # already f32
            xi = jax.nn.silu(y).astype(jnp.bfloat16) if lyr["silu"] else y
            continue
        feat, act = conv2d_pallas(xi, lyr["w"], lyr["b"], lyr["stride"],
                                  lyr["pad"], lyr["silu"],
                                  tile_rows=tile_rows, hoist_weights=hoist_weights)
        # PyTorch-layout NCHW f32 features; the bf16->f32 cast fuses with this
        # transpose so the kernel's bf16 feature writeback stays halved.
        features.append(jnp.transpose(feat, (0, 3, 1, 2)).astype(jnp.float32))
        xi = act if lyr["silu"] else feat
    # score = x.reshape(B, -1).mean(-1); XLA's native reduce is optimal here.
    last = features[-1]
    score = jnp.mean(last.reshape(last.shape[0], -1), axis=-1)
    return score, features


# --------------------------------------------------------------------------------
# Pure-JAX reference with the same bf16-input / f32-accumulate numerics
# --------------------------------------------------------------------------------
def shared_conv_net_reference(x, params):
    rnd = lambda a: a.astype(jnp.bfloat16).astype(jnp.float32)
    xi = rnd(x)
    features = []
    for lyr in params:
        w = rnd(jnp.transpose(lyr["w"], (3, 2, 0, 1)))       # OIHW
        y = jax.lax.conv_general_dilated(
            xi, w, (lyr["stride"], lyr["stride"]),
            [(lyr["pad"], lyr["pad"])] * 2,
            dimension_numbers=("NCHW", "OIHW", "NCHW"),
            precision=jax.lax.Precision.HIGHEST)
        y = y + lyr["b"][None, :, None, None]
        features.append(y)
        xi = rnd(jax.nn.silu(y)) if lyr["silu"] else y
    score = jnp.mean(features[-1].reshape(x.shape[0], -1), axis=-1)
    return score, features


if __name__ == "__main__":
    key = jax.random.PRNGKey(0)
    # Configs exercise: the full-im2col small-K path with W_out padding & H tiling,
    # the production kernel_size=15 / stride=4 geometry, the polyphase path with a
    # hoisted (VMEM-resident) weight, and the polyphase streamed-weight + halo path.
    configs = [
        (2, 2, 48, 12, dict(capacity=8, n_layers=2, kernel_size=7, stride=2), 8, None),
        (1, 1, 96, 8,  dict(capacity=4, n_layers=2, kernel_size=15, stride=4), 16, None),
        (1, 2, 64, 16, dict(capacity=32, n_layers=2, kernel_size=15, stride=4), None, None),
        (1, 2, 64, 16, dict(capacity=32, n_layers=2, kernel_size=15, stride=4), 2, False),
    ]
    for B, C, H, W, net_kwargs, tr, hoist in configs:
        key, kx, kp = jax.random.split(key, 3)
        x = jax.random.normal(kx, (B, C, H, W), jnp.float32)
        params = init_params(kp, C, **net_kwargs)

        score, feats = shared_conv_net_forward(x, params, tile_rows=tr,
                                               hoist_weights=hoist)
        score = jax.block_until_ready(score)
        feats = [jax.block_until_ready(f) for f in feats]

        score_ref, feats_ref = shared_conv_net_reference(x, params)
        np.testing.assert_allclose(np.asarray(score), np.asarray(score_ref),
                                   rtol=2e-3, atol=2e-3)
        assert len(feats) == len(feats_ref)
        for f, fr in zip(feats, feats_ref):
            assert f.shape == fr.shape, (f.shape, fr.shape)
            # conv features are stored in bf16 by the kernels -> bf16-level tolerance
            np.testing.assert_allclose(np.asarray(f), np.asarray(fr),
                                       rtol=1e-2, atol=1e-2)
    print("KERNEL_OK")
</pallas_src>

<mosaic_0001>
module attributes {stable_mosaic.version = 11 : i64} {
  func.func @kernel(%arg0: i32, %arg1: i32, %arg2: memref<1x1x64x98xbf16, #tpu.memory_space<vmem>>, %arg3: memref<1x98x128xbf16, #tpu.memory_space<vmem>>, %arg4: memref<1x128xf32, #tpu.memory_space<vmem>>, %arg5: memref<1x64x128xbf16, #tpu.memory_space<vmem>>, %arg6: memref<1x64x128xbf16, #tpu.memory_space<vmem>>) attributes {dimension_semantics = [#tpu.dimension_semantics<parallel>, #tpu.dimension_semantics<arbitrary>], iteration_bounds = array<i64: 6, 1>, scalar_prefetch = 0 : i64, scratch_operands = 0 : i64, tpu.core_type = #tpu.core_type<tc>, window_params = [{transform_indices = @transform_0, window_bounds = array<i64: 1, 1, 64, 98>}, {transform_indices = @transform_1, window_bounds = array<i64: 1, 98, 128>}, {pipeline_mode = #tpu.pipeline_mode<synchronous>, transform_indices = @transform_2, window_bounds = array<i64: 1, 128>}, {transform_indices = @transform_3, window_bounds = array<i64: 1, 64, 128>}, {transform_indices = @transform_4, window_bounds = array<i64: 1, 64, 128>}]} {
    %c0 = arith.constant 0 : index
    %c0_0 = arith.constant 0 : index
    %c0_1 = arith.constant 0 : index
    %c0_2 = arith.constant 0 : index
    %0 = vector.load %arg2[%c0, %c0_0, %c0_1, %c0_2] : memref<1x1x64x98xbf16, #tpu.memory_space<vmem>>, vector<1x1x64x98xbf16>
    %1 = vector.shape_cast %0 : vector<1x1x64x98xbf16> to vector<64x98xbf16>
    %c0_3 = arith.constant 0 : index
    %c0_4 = arith.constant 0 : index
    %c0_5 = arith.constant 0 : index
    %2 = vector.load %arg3[%c0_3, %c0_4, %c0_5] : memref<1x98x128xbf16, #tpu.memory_space<vmem>>, vector<1x98x128xbf16>
    %3 = vector.shape_cast %2 : vector<1x98x128xbf16> to vector<98x128xbf16>
    %cst = arith.constant dense<0.000000e+00> : vector<64x128xf32>
    %4 = tpu.matmul %1, %3, %cst {dimension_numbers = #tpu.dot_dimension_numbers<[1], [0], [0], [1], [0, 0, 1, 1], [], []>} : vector<64x98xbf16>, vector<98x128xbf16>, vector<64x128xf32> -> vector<64x128xf32>
    %c0_6 = arith.constant 0 : index
    %c0_7 = arith.constant 0 : index
    %5 = vector.load %arg4[%c0_6, %c0_7] : memref<1x128xf32, #tpu.memory_space<vmem>>, vector<1x128xf32>
    %6 = vector.broadcast %5 : vector<1x128xf32> to vector<64x128xf32>
    %7 = arith.addf %4, %6 : vector<64x128xf32>
    %8 = arith.truncf %7 : vector<64x128xf32> to vector<64x128xbf16>
    %c0_8 = arith.constant 0 : index
    %c0_9 = arith.constant 0 : index
    %c0_10 = arith.constant 0 : index
    %9 = vector.load %arg5[%c0_8, %c0_9, %c0_10] : memref<1x64x128xbf16, #tpu.memory_space<vmem>>, vector<1x64x128xbf16>
    %10 = vector.shape_cast %9 : vector<1x64x128xbf16> to vector<64x128xbf16>
    %11 = vector.shape_cast %8 : vector<64x128xbf16> to vector<1x64x128xbf16>
    tpu.vector_store %arg5[%c0_8, %c0_9, %c0_10], %11 {strides = array<i32>} : memref<1x64x128xbf16, #tpu.memory_space<vmem>>, vector<1x64x128xbf16>,
    %12 = arith.negf %7 : vector<64x128xf32>
    %13 = math.exp %12 : vector<64x128xf32>
    %cst_11 = arith.constant 1.000000e+00 : f32
    %14 = vector.broadcast %cst_11 : f32 to vector<64x128xf32>
    %15 = arith.addf %14, %13 : vector<64x128xf32>
    %16 = arith.divf %14, %15 : vector<64x128xf32>
    %17 = arith.mulf %7, %16 : vector<64x128xf32>
    %18 = arith.truncf %17 : vector<64x128xf32> to vector<64x128xbf16>
    %c0_12 = arith.constant 0 : index
    %c0_13 = arith.constant 0 : index
    %c0_14 = arith.constant 0 : index
    %19 = vector.load %arg6[%c0_12, %c0_13, %c0_14] : memref<1x64x128xbf16, #tpu.memory_space<vmem>>, vector<1x64x128xbf16>
    %20 = vector.shape_cast %19 : vector<1x64x128xbf16> to vector<64x128xbf16>
    %21 = vector.shape_cast %18 : vector<64x128xbf16> to vector<1x64x128xbf16>
    tpu.vector_store %arg6[%c0_12, %c0_13, %c0_14], %21 {strides = array<i32>} : memref<1x64x128xbf16, #tpu.memory_space<vmem>>, vector<1x64x128xbf16>,
    return
  }
  func.func @transform_0(%arg0: i32, %arg1: i32) -> (i32, i32, i32, i32) {
    %c0_i32 = arith.constant 0 : i32
    %c0_i32_0 = arith.constant 0 : i32
    %c0_i32_1 = arith.constant 0 : i32
    return %arg0, %arg1, %c0_i32, %c0_i32_0 : i32, i32, i32, i32
  }
  func.func @transform_1(%arg0: i32, %arg1: i32) -> (i32, i32, i32) {
    %c0_i32 = arith.constant 0 : i32
    %c0_i32_0 = arith.constant 0 : i32
    %c0_i32_1 = arith.constant 0 : i32
    return %arg1, %c0_i32, %c0_i32_0 : i32, i32, i32
  }
  func.func @transform_2(%arg0: i32, %arg1: i32) -> (i32, i32) {
    %c0_i32 = arith.constant 0 : i32
    %c0_i32_0 = arith.constant 0 : i32
    %c0_i32_1 = arith.constant 0 : i32
    return %c0_i32, %c0_i32_0 : i32, i32
  }
  func.func @transform_3(%arg0: i32, %arg1: i32) -> (i32, i32, i32) {
    %c0_i32 = arith.constant 0 : i32
    %c0_i32_0 = arith.constant 0 : i32
    %c0_i32_1 = arith.constant 0 : i32
    return %arg0, %c0_i32, %c0_i32_0 : i32, i32, i32
  }
  func.func @transform_4(%arg0: i32, %arg1: i32) -> (i32, i32, i32) {
    %c0_i32 = arith.constant 0 : i32
    %c0_i32_0 = arith.constant 0 : i32
    %c0_i32_1 = arith.constant 0 : i32
    return %arg0, %c0_i32, %c0_i32_0 : i32, i32, i32
  }
}

</mosaic_0001>

<bundles_post_ra>
// kernel: tpu_custom_call.1
= control target key start
LH: loop header
LB: loop body
LE: loop exit
PB: predicated region body
PF: predicated region fallthrough
CT: control target
= control target key end

     0   :  { %10 = vsyncpa [#allocation3], 0  ;;  %s1575_s0 = inlined_call_operand.hbm [shape: bf16[6,1,64,98], index: 0, kind: input, shape index: {}]   ;;  %s1576_s1 = inlined_call_operand.hbm [shape: bf16[1,98,128], index: 1, kind: input, shape index: {}]   ;;  %s1577_s2 = inlined_call_operand.vmem [shape: f32[1,128], index: 2, kind: input, shape index: {}]   ;;  %s1578_s3 = inlined_call_operand.hbm [shape: bf16[6,64,128], index: 3, kind: output, shape index: {0}]   ;;  %s1579_s4 = inlined_call_operand.hbm [shape: bf16[6,64,128], index: 4, kind: output, shape index: {1}]  }
   0x1   :  { %12 = vsyncpa [#allocation3 + $0x1], 0 }
   0x2   :  { %13 = vsyncpa [#allocation6], 0 }
   0x3   :  { %14 = vsyncpa [#allocation4], 0 }
   0x4   :  { %16 = vsyncpa [#allocation4 + $0x1], 0 }
   0x5   :  { %17 = vsyncpa [#allocation9], 0 }
   0x6   :  { %19 = vsyncpa [#allocation9 + $0x1], 0  ;;  %s1246_s15 = smov 0   ;;  %s1248_s16 = smov 0  }
   0x7   :  { %s1250_s17 = smov 0   ;;  %s1252_s18 = smov 0  }
   0x8   :  { %s1254_s19 = smov 0   ;;  %s1256_s20 = smov 0  }
   0x9 LB: > { %s735_s21 = sadd.s32 4294967295, %s1211_s20   ;;  %s736_s22 = sadd.s32 4294967294, %s1211_s20   ;;  %s1211_s20 = sphi %s1256_s20, %s25_s20   ;;  %s1207_s19 = sphi %s1254_s19, %s1602_s19   ;;  %s1203_s18 = sphi %s1252_s18, %s1601_s18   ;;  %s1199_s17 = sphi %s1250_s17, %s1600_s17   ;;  %s1195_s16 = sphi %s1248_s16, %s1599_s16   ;;  %s1191_s15 = sphi %s1246_s15, %s1598_s15  }
   0xa   : > { %p59_p0 = scmp.ne.s32.totalorder %s1195_s16, %s1191_s15  ;;  %p1280_p1 = scmp.eq.s32.totalorder %s735_s21, 0 }
   0xb   : > { %p1284_p2 = scmp.eq.s32.totalorder %s735_s21, 5  ;;  %p136_p3 = scmp.eq.s32.totalorder %s736_s22, 5 }
   0xc   : > { %s1584_s23 = scalar_select %p1280_p1, 1, 0 }
   0xd   : > { %s1585_s24 = scalar_select %p1284_p2, 1, 0 }
   0xe   : > { %p1290_p4 = por %p1280_p1, %p59_p0  ;;  %p737_p5 = scmp.ge.s32.totalorder %s1211_s20, 1 }
   0xf   : > { %p1295_p6 = por %p136_p3, %p59_p0  ;;  %p169_p7 = scmp.lt.s32.totalorder %s1211_s20, 7 }
  0x10   : > { %s1586_s25 = scalar_select %p1290_p4, 1, 0 }
  0x11   : > { %s1587_s26 = scalar_select %p1295_p6, 1, 0 }
  0x12   : > { %p1300_p8 = pnand %p737_p5, %p169_p7  ;;  %s1213_s28 = smov [#allocation5]  }
  0x13   : > { %s184_s29 = sshll.u32 %s1213_s28, 4  ;;  %s37_s5 = sadd.s32 1, %s1207_s19  ;;  %s185_s29 = int_to_ptr.vmem [resolvable:$true] %s184_s29 }
  0x14   : > { %s1588_s27 = scalar_select %p1300_p8, 1, 0 }
  0x15   : > { %p920_p9 = pneg %p1300_p8  ;;  %s1035_s8 = scalar_lea.hbm %s1576_s1, 832 }
  0x16   : > { %p1036_p11 = scmp.ne.s32.totalorder %s1576_s1, %s1035_s8  ;;  %p1042_p3 = scmp.lt.u32.totalorder %s1035_s8, %s1576_s1 }
  0x17   : > { %p1308_p10 = pnand %p920_p9, %p1280_p1 }
  0x19   : > { %p1037_p12 = pneg %p1308_p10 }
  0x1b   : > { %p1038_p13 = pnand %p1037_p12, %p1036_p11 }
  0x1d   : > { %p1039_p0 = pneg %p1038_p13 }
  0x1f   : > { %p1044_p5 = pnand %p1042_p3, %p1039_p0 }
  0x21   : > { %1047 = shalt.err (!%p1044_p5)
}
  0x22   : > { %s1048_s13 = scalar_lea.vmem %s185_s29, 832  ;;  %p1056_p1 = scmp.lt.s32.totalorder %s185_s29, %s185_s29 }
  0x23   : > { %p1049_p7 = scmp.ne.s32.totalorder %s185_s29, %s1048_s13  ;;  %p1057_p4 = scmp.lt.s32.totalorder %s1048_s13, %s1048_s13 }
  0x25   : > { %p1051_p9 = pnand %p1049_p7, %p1037_p12  ;;  %p1058_p8 = por %p1057_p4, %p1056_p1 }
  0x27   : > { %p1052_p6 = pneg %p1051_p9 }
  0x29   : > { %p1059_p2 = pnand %p1058_p8, %p1052_p6 }
  0x2b   : > { %1062 = shalt.err (!%p1059_p2)
}
  0x2c   : > { %s1214_s14 = smov 64   ;;  %s1215_s21 = smov 4  }
  0x2d   : > { %923 = dma.hbm_to_vmem [thread:$0]  (!%p1308_p10), %s1576_s1, 832, %s185_s29, [#allocation6], %s1214_s14, %s1214_s14, %s1215_s21  }
  0x2e   : > { %p39_p1 = scmp.ge.s32.totalorder %s37_s5, 6  ;;  %s46_s6 = sadd.s32 1, %s1199_s17 }
  0x2f   : > { %p53_p2 = scmp.ne.s32.totalorder %s1199_s17, %s1195_s16  ;;  %p54_p4 = scmp.eq.s32.totalorder %s1211_s20, 0 }
  0x30   : > { %s1604_s5 = smov (%p39_p1, %s37_s5), 0  ;;  %p1591_p8 = scmp.ne.s32.totalorder %s1585_s24, 0 }
  0x31   : > { %p1338_p6 = por %p54_p4, %p53_p2  ;;  %s41_s8 = ssub.s32 %s1207_s19, %s1604_s5 }
  0x32   : > { %p1344_p11 = por %p1591_p8, %p53_p2  ;;  %p936_p12 = scmp.lt.s32.totalorder %s1211_s20, 6 }
  0x33   : > { %p44_p10 = scmp.eq.s32.totalorder %s41_s8, 0  ;;  %s201_s29 = sand.u32 1, %s1199_s17  }
  0x34   : > { %s740_s9 = sshll.u32 %s201_s29, 5  ;;  %s796_s11 = sshll.u32 %s1207_s19, 9 }
  0x35   : > { %s1353_s10 = scalar_select %p44_p10, %s1199_s17, %s46_s6  }
  0x36   : > { %s1359_s22 = scalar_lea.hbm %s1575_s0, %s796_s11  ;;  %s205_s24 = scalar_lea.vmem [#allocation2], %s740_s9 }
  0x37   : > { %s214_s28 = sshll.u32 %s205_s24, 4  ;;  %p1365_p13 = pnand %p936_p12, %p1338_p6  ;;  %s1361_s28 = int_to_ptr.vmem [resolvable:$true] %s214_s28 }
  0x38   : > { %s1369_s6 = scalar_lea.sflag [#allocation3], %s201_s29  ;;  %s1063_s12 = scalar_lea.hbm %s1359_s22, 512 }
  0x39   : > { %p1064_p0 = scmp.ne.s32.totalorder %s1359_s22, %s1063_s12  ;;  %p1065_p3 = pneg %p1365_p13 }
  0x3a   : > { %s1068_s7 = scalar_lea.hbm %s1575_s0, 3072  ;;  %p1069_p9 = scmp.lt.u32.totalorder %s1359_s22, %s1575_s0 }
  0x3b   : > { %p1066_p5 = pnand %p1065_p3, %p1064_p0  ;;  %p1070_p1 = scmp.lt.u32.totalorder %s1068_s7, %s1063_s12 }
  0x3c   : > { %p1072_p4 = scmp.lt.u32.totalorder %s1063_s12, %s1359_s22 }
  0x3d   : > { %p1067_p7 = pneg %p1066_p5  ;;  %p1071_p2 = por %p1070_p1, %p1069_p9 }
  0x3f   : > { %p1073_p6 = por %p1072_p4, %p1071_p2 }
  0x41   : > { %p1074_p8 = pnand %p1073_p6, %p1067_p7 }
  0x43   : > { %1077 = shalt.err (!%p1074_p8)
}
  0x44   : > { %s1078_s29 = scalar_lea.vmem %s1361_s28, 512  ;;  %s1216_s9 = smov [#allocation2]  }
  0x45   : > { %p1079_p12 = scmp.ne.s32.totalorder %s1361_s28, %s1078_s29  ;;  %s1083_s11 = sshll.u32 %s1216_s9, 4  ;;  %s1084_s11 = int_to_ptr.vmem [resolvable:$false] %s1083_s11 }
  0x46   : > { %s1085_s13 = scalar_lea.vmem %s1084_s11, 1024  ;;  %p1086_p5 = scmp.lt.s32.totalorder %s1361_s28, %s1084_s11 }
  0x47   : > { %p1081_p10 = pnand %p1079_p12, %p1065_p3  ;;  %p1087_p9 = scmp.lt.s32.totalorder %s1085_s13, %s1078_s29 }
  0x49   : > { %p1082_p0 = pneg %p1081_p10  ;;  %p1088_p1 = por %p1087_p9, %p1086_p5 }
  0x4b   : > { %p1089_p2 = pnand %p1088_p1, %p1082_p0 }
  0x4d   : > { %1092 = shalt.err (!%p1089_p2)
}
  0x4e   : > { %927 = dma.hbm_to_vmem [thread:$0]  (!%p1365_p13), %s1359_s22, 512, %s1361_s28, %s1369_s6, %s1214_s14, %s1214_s14, %s1215_s21  }
  0x4f   : > { %p1594_p3 = scmp.ne.s32.totalorder %s1588_s27, 0 }
  0x50   : > { %s1403_s12 = sand.u32 (!%p1594_p3), 1, %s1195_s16   ;;  %p1595_p7 = scmp.ne.s32.totalorder (!%p1594_p3), %s1586_s25, 0 }
  0x51   : > { %226 = sbr.rel (%p1594_p3) target bundleno = 398 (0x18e), region = 32  ;;  %s1406_s7 = sshll.u32 (!%p1594_p3), %s1403_s12, 5 }
  0x52   : > { %s229_s8 = scalar_lea.sflag (!%p1594_p3), [#allocation3], %s1403_s12  ;;  %s1410_s24 = scalar_lea.vmem (!%p1594_p3), [#allocation2], %s1406_s7 }
  0x58   : > { %1174 = dma.done.wait (%p1595_p7), %s229_s8, 512  }
  0x59   : > { %1176 = vsyncadd (%p1595_p7), %s229_s8, 4294966784  ;;  %p1596_p13 = scmp.ne.s32.totalorder %s1584_s23, 0 }
  0x5b   : > { %1178 = dma.done.wait (%p1596_p13), [#allocation6], 832  }
  0x5c   : > { %1180 = vsyncadd (%p1596_p13), [#allocation6], 4294966464  ;;  %v992_v0 = vld [vmem:[#allocation5] sm:$0xff]   ;;  %v993_v1 = vld [vmem:[#allocation5 + $0x8] sm:$0xff]   ;;  %vm354_vm0 = vcmask 801792   ;;  %vm367_vm1 = vcmask 1040384  }
  0x5d   : > { %872 = vmatprep.subr.bf16.mxu0 %v992_v0  ;;  %894 = vmatprep.subr.bf16.mxu1 %v992_v0  ;;  %v994_v2 = vld [vmem:[#allocation5 + $0x10] sm:$0xff]   ;;  %v995_v3 = vld [vmem:[#allocation5 + $0x18] sm:$0xff]   ;;  %v999_v4 = vld [vmem:[%s1410_s24] sm:$0xff]   ;;  %s1440_s27 = scalar_lea.vmem [#allocation7], %s1406_s7  ;;  %s813_s21 = sshll.u32 %s1203_s18, 9 }
  0x5e   : > { %873 = vmatpush3.bf16.msra.mxu0 %v992_v0  ;;  %901 = vmatpush3.bf16.msra.mxu1 %v992_v0  ;;  %v1000_v5 = vld [vmem:[%s1410_s24 + $0x10] sm:$0xff]   ;;  %v996_v6 = vld [vmem:[#allocation5 + $0x20] sm:$0xff]   ;;  %v997_v7 = vld [vmem:[#allocation5 + $0x28] sm:$0xff]   ;;  %s591_s14 = sshll.u32 %s1440_s27, 4  ;;  %s1471_s6 = scalar_lea.hbm %s1578_s3, %s813_s21  ;;  %s1459_s14 = int_to_ptr.vmem [resolvable:$true] %s591_s14 }
  0x5f   : > { %874 = vmatprep.subr.bf16.mxu0 %v993_v1  ;;  %895 = vmatprep.subr.bf16.mxu1 %v993_v1  ;;  %v998_v8 = vld [vmem:[#allocation5 + $0x30] ss:$0 sps:$4 sm:$0x11]   ;;  %v1001_v10 = vld [vmem:[%s1410_s24 + $0x8] sm:$0xff]   ;;  %v1002_v11 = vld [vmem:[%s1410_s24 + $0x18] sm:$0xff]   ;;  %s573_s29 = scalar_lea.sflag [#allocation4], %s1403_s12 }
  0x60   : > { %886 = vmatprep.mubr.msk.bf16.mxu0 %vm354_vm0, %v999_v4  ;;  %890 = vmatprep.mubr.msk.bf16.mxu1 %vm354_vm0, %v1000_v5  ;;  %v369_v9 = vsel %vm367_vm1, %v998_v8, 0  ;;  %v748_v12 = vld [vmem:[%s1577_s2] ss:$0 sm:$0xff]  ;;  %s1093_s9 = scalar_lea.vmem %s1459_s14, 512  ;;  %s1217_s11 = smov [#allocation7]  }
  0x61   : > { %p1094_p4 = scmp.ne.s32.totalorder %s1459_s14, %s1093_s9  ;;  %s1097_s13 = sshll.u32 %s1217_s11, 4  ;;  %s1098_s13 = int_to_ptr.vmem [resolvable:$false] %s1097_s13 }
  0x62   : > { %875 = vmatpush3.bf16.msra.mxu0 %v993_v1  ;;  %902 = vmatpush3.bf16.msra.mxu1 %v993_v1  ;;  %s1099_s8 = scalar_lea.vmem %s1098_s13, 1024  ;;  %p1100_p12 = scmp.lt.s32.totalorder %s1459_s14, %s1098_s13 }
  0x63   : > { %876 = vmatprep.subr.bf16.mxu0 %v994_v2  ;;  %896 = vmatprep.subr.bf16.mxu1 %v994_v2  ;;  %p1095_p6 = pnand %p1094_p4, %p1344_p11  ;;  %p1101_p10 = scmp.lt.s32.totalorder %s1099_s8, %s1093_s9 }
  0x65   : > { %p1096_p8 = pneg %p1095_p6  ;;  %p1102_p0 = por %p1101_p10, %p1100_p12 }
  0x66   : > { %877 = vmatpush3.bf16.msra.mxu0 %v994_v2  ;;  %903 = vmatpush3.bf16.msra.mxu1 %v994_v2 }
  0x67   : > { %878 = vmatprep.subr.bf16.mxu0 %v995_v3  ;;  %897 = vmatprep.subr.bf16.mxu1 %v995_v3  ;;  %p1103_p5 = pnand %p1102_p0, %p1096_p8 }
  0x6a   : > { %879 = vmatpush3.bf16.msra.mxu0 %v995_v3  ;;  %904 = vmatpush3.bf16.msra.mxu1 %v995_v3 }
  0x6b   : > { %880 = vmatprep.subr.bf16.mxu0 %v996_v6  ;;  %898 = vmatprep.subr.bf16.mxu1 %v996_v6 }
  0x6e   : > { %881 = vmatpush3.bf16.msra.mxu0 %v996_v6  ;;  %905 = vmatpush3.bf16.msra.mxu1 %v996_v6 }
  0x6f   : > { %882 = vmatprep.subr.bf16.mxu0 %v997_v7  ;;  %899 = vmatprep.subr.bf16.mxu1 %v997_v7 }
  0x72   : > { %883 = vmatpush3.bf16.msra.mxu0 %v997_v7  ;;  %906 = vmatpush3.bf16.msra.mxu1 %v997_v7 }
  0x73   : > { %908 = vmatprep.subr.msk.bf16.mxu0 %vm367_vm1, %v998_v8  ;;  %909 = vmatprep.subr.msk.bf16.mxu1 %vm367_vm1, %v998_v8 }
  0x76   : > { %885 = vmatpush3.bf16.msra.mxu0 %v369_v9  ;;  %907 = vmatpush3.bf16.msra.mxu1 %v369_v9 }
  0x79   : > { %887 = vmatmul.mubr.msk.bf16.vlgmr.msra.gmra.mrb[0].mxu0 %vm354_vm0, %v1001_v10  ;;  %891 = vmatmul.mubr.msk.bf16.vlgmr.msra.gmra.mrb[0].mxu1 %vm354_vm0, %v1002_v11 }
 0x14c   : > { %v888_v13 = vpop.f32.mrb[0].mxu0  ;;  %v892_v14 = vpop.f32.mrb[0].mxu1 }
 0x14d   : > { %v1431_v15 = vadd.f32 %v888_v13, %v748_v12  ;;  %v1433_v16 = vadd.f32 %v892_v14, %v748_v12  ;;  %v405_v17 = vpop.f32.mrb[1].mxu0  ;;  %v421_v18 = vpop.f32.mrb[1].mxu1 }
 0x14e   : > { %v1435_v19 = vadd.f32 %v748_v12, %v405_v17  ;;  %v1437_v20 = vadd.f32 %v748_v12, %v421_v18  ;;  %v889_v21 = vpop.f32.mrb[2].mxu0  ;;  %v893_v22 = vpop.f32.mrb[2].mxu1 }
 0x14f   : > { %v774_v23 = vmul.f32 -1.442695, %v1431_v15  ;;  %v778_v24 = vmul.f32 -1.442695, %v1433_v16  ;;  %v1446_v25 = vadd.f32 %v889_v21, %v748_v12  ;;  %v1448_v26 = vadd.f32 %v893_v22, %v748_v12  ;;  %v408_v27 = vpop.f32.mrb[3].mxu0  ;;  %v424_v28 = vpop.f32.mrb[3].mxu1 }
 0x150   : > { %v772_v29 = vmul.f32 -1.442695, %v1435_v19  ;;  %v776_v30 = vmul.f32 -1.442695, %v1437_v20  ;;  %v1452_v31 = vadd.f32 %v748_v12, %v408_v27  ;;  %v1454_v32 = vadd.f32 %v748_v12, %v424_v28 }
 0x151   : > { %1003 = vpow2.f32 %v774_v23  ;;  %v823_v33 = vpack.c.bf16 %v1446_v25, %v1431_v15  ;;  %v775_v34 = vmul.f32 -1.442695, %v1446_v25  ;;  %v833_v35 = vpack.c.bf16 %v1448_v26, %v1433_v16 }
 0x152   : > { %1005 = vpow2.f32 %v778_v24  ;;  %v779_v36 = vmul.f32 -1.442695, %v1448_v26  ;;  %v818_v37 = vpack.c.bf16 %v1452_v31, %v1435_v19  ;;  %v773_v38 = vmul.f32 -1.442695, %v1452_v31 }
 0x153   : > { %1007 = vpow2.f32 %v772_v29  ;;  %855 = vst [vmem:[%s1440_s27 + $0x8] sm:$0xff] %v823_v33   ;;  %857 = vst [vmem:[%s1440_s27 + $0x18] sm:$0xff] %v833_v35   ;;  %v828_v39 = vpack.c.bf16 %v1454_v32, %v1437_v20  ;;  %v777_v40 = vmul.f32 -1.442695, %v1454_v32 }
 0x154   : > { %1009 = vpow2.f32 %v776_v30  ;;  %819 = vst [vmem:[%s1440_s27] sm:$0xff] %v818_v37  }
 0x155   : > { %1011 = vpow2.f32 %v775_v34  ;;  %856 = vst [vmem:[%s1440_s27 + $0x10] sm:$0xff] %v828_v39  }
 0x156   : > { %1013 = vpow2.f32 %v779_v36 }
 0x157   : > { %1106 = shalt.err (!%p1103_p5)
}
 0x158   : > { %s1107_s24 = scalar_lea.hbm %s1471_s6, 512  ;;  %s1111_s27 = scalar_lea.hbm %s1578_s3, 3072 }
 0x159   : > { %p1108_p9 = scmp.ne.s32.totalorder %s1471_s6, %s1107_s24  ;;  %p1112_p3 = scmp.lt.u32.totalorder %s1471_s6, %s1578_s3 }
 0x15a   : > { %p1113_p7 = scmp.lt.u32.totalorder %s1111_s27, %s1107_s24  ;;  %p1115_p4 = scmp.lt.u32.totalorder %s1107_s24, %s1471_s6 }
 0x15b   : > { %p1109_p1 = pnand %p1108_p9, %p1344_p11 }
 0x15c   : > { %p1114_p13 = por %p1113_p7, %p1112_p3 }
 0x15d   : > { %p1110_p2 = pneg %p1109_p1 }
 0x15e   : > { %p1116_p6 = por %p1115_p4, %p1114_p13 }
 0x160   : > { %p1117_p8 = pnand %p1116_p6, %p1110_p2 }
 0x162   : > { %1120 = shalt.err (!%p1117_p8)
}
 0x163   : > { %s1218_s9 = smov 64   ;;  %s1219_s11 = smov 4   ;;  %1015 = vpow2.f32 %v773_v38  ;;  %v1004_v41 = vpop.eup %1003 }
 0x164   : > { %916 = dma.vmem_to_hbm [thread:$0]  (%p1344_p11), %s1459_s14, 512, %s1471_s6, %s573_s29, %s1218_s9, %s1218_s9, %s1219_s11   ;;  %1017 = vpow2.f32 %v777_v40  ;;  %v1006_v42 = vpop.eup %1005  ;;  %v502_v43 = vadd.f32 1.0, %v1004_v41 }
 0x165   : > { %v1008_v44 = vpop.eup %1007  ;;  %v506_v45 = vadd.f32 1.0, %v1006_v42  ;;  %s265_s14 = scalar_lea.vmem [#allocation8], %s1406_s7  ;;  %s1524_s13 = scalar_lea.hbm %s1579_s4, %s813_s21 }
 0x166   : > { %v1010_v46 = vpop.eup %1009  ;;  %1019 = vrcp.f32 %v502_v43  ;;  %v500_v47 = vadd.f32 1.0, %v1008_v44  ;;  %s607_s6 = sshll.u32 %s265_s14, 4  ;;  %s578_s8 = scalar_lea.sflag [#allocation9], %s1403_s12  ;;  %s1517_s6 = int_to_ptr.vmem [resolvable:$true] %s607_s6 }
 0x167   : > { %v1012_v48 = vpop.eup %1011  ;;  %1021 = vrcp.f32 %v506_v45  ;;  %v504_v49 = vadd.f32 1.0, %v1010_v46  ;;  %s1121_s24 = scalar_lea.vmem %s1517_s6, 512  ;;  %s1220_s23 = smov [#allocation8]  }
 0x168   : > { %v1014_v50 = vpop.eup %1013  ;;  %1023 = vrcp.f32 %v500_v47  ;;  %v503_v51 = vadd.f32 1.0, %v1012_v48  ;;  %p1122_p12 = scmp.ne.s32.totalorder %s1517_s6, %s1121_s24  ;;  %s1125_s25 = sshll.u32 %s1220_s23, 4  ;;  %s1126_s25 = int_to_ptr.vmem [resolvable:$false] %s1125_s25 }
 0x169   : > { %1025 = vrcp.f32 %v504_v49  ;;  %v507_v53 = vadd.f32 1.0, %v1014_v50  ;;  %s1127_s27 = scalar_lea.vmem %s1126_s25, 1024  ;;  %p1128_p5 = scmp.lt.s32.totalorder %s1517_s6, %s1126_s25 }
 0x16a   : > { %1027 = vrcp.f32 %v503_v51  ;;  %p1123_p10 = pnand %p1122_p12, %p1344_p11  ;;  %p1129_p9 = scmp.lt.s32.totalorder %s1127_s27, %s1121_s24 }
 0x16b   : > { %1029 = vrcp.f32 %v507_v53 }
 0x16c   : > { %p1124_p0 = pneg %p1123_p10  ;;  %p1130_p1 = por %p1129_p9, %p1128_p5 }
 0x16d   : > { %v1016_v52 = vpop.eup %1015 }
 0x16e   : > { %v1018_v54 = vpop.eup %1017  ;;  %v501_v55 = vadd.f32 1.0, %v1016_v52  ;;  %p1131_p2 = pnand %p1130_p1, %p1124_p0 }
 0x16f   : > { %v505_v56 = vadd.f32 1.0, %v1018_v54 }
 0x170   : > { %1031 = vrcp.f32 %v501_v55  ;;  %v1020_v57 = vpop.eup %1019 }
 0x171   : > { %1033 = vrcp.f32 %v505_v56  ;;  %v1022_v58 = vpop.eup %1021  ;;  %v526_v63 = vmul.f32 %v1020_v57, %v1431_v15 }
 0x172   : > { %v1024_v59 = vpop.eup %1023  ;;  %v530_v2 = vmul.f32 %v1022_v58, %v1433_v16 }
 0x173   : > { %v1026_v60 = vpop.eup %1025  ;;  %v524_v5 = vmul.f32 %v1024_v59, %v1435_v19 }
 0x174   : > { %v1028_v61 = vpop.eup %1027  ;;  %v528_v8 = vmul.f32 %v1026_v60, %v1437_v20 }
 0x175   : > { %v1030_v62 = vpop.eup %1029  ;;  %v527_v0 = vmul.f32 %v1028_v61, %v1446_v25 }
 0x176   : > { %v531_v3 = vmul.f32 %v1030_v62, %v1448_v26 }
 0x177   : > { %v843_v6 = vpack.c.bf16 %v527_v0, %v526_v63 }
 0x178   : > { %v853_v9 = vpack.c.bf16 %v531_v3, %v530_v2 }
 0x179   : > { %858 = vst [vmem:[%s265_s14 + $0x8] sm:$0xff] %v843_v6  }
 0x17a   : > { %v1032_v1 = vpop.eup %1031  ;;  %860 = vst [vmem:[%s265_s14 + $0x18] sm:$0xff] %v853_v9  }
 0x17b   : > { %v1034_v4 = vpop.eup %1033  ;;  %v525_v7 = vmul.f32 %v1032_v1, %v1452_v31 }
 0x17c   : > { %v529_v10 = vmul.f32 %v1034_v4, %v1454_v32 }
 0x17d   : > { %v838_v11 = vpack.c.bf16 %v525_v7, %v524_v5 }
 0x17e   : > { %v848_v12 = vpack.c.bf16 %v529_v10, %v528_v8 }
 0x17f   : > { %839 = vst [vmem:[%s265_s14] sm:$0xff] %v838_v11  }
 0x180   : > { %859 = vst [vmem:[%s265_s14 + $0x10] sm:$0xff] %v848_v12  }
 0x181   : > { %1134 = shalt.err (!%p1131_p2)
}
 0x182   : > { %s1135_s18 = scalar_lea.hbm %s1524_s13, 512  ;;  %s1139_s28 = scalar_lea.hbm %s1579_s4, 3072 }
 0x183   : > { %p1136_p3 = scmp.ne.s32.totalorder %s1524_s13, %s1135_s18  ;;  %p1140_p4 = scmp.lt.u32.totalorder %s1524_s13, %s1579_s4 }
 0x184   : > { %p1141_p6 = scmp.lt.u32.totalorder %s1139_s28, %s1135_s18  ;;  %p1143_p12 = scmp.lt.u32.totalorder %s1135_s18, %s1524_s13 }
 0x185   : > { %p1137_p7 = pnand %p1136_p3, %p1344_p11 }
 0x186   : > { %p1142_p8 = por %p1141_p6, %p1140_p4 }
 0x187   : > { %p1138_p13 = pneg %p1137_p7 }
 0x188   : > { %p1144_p10 = por %p1143_p12, %p1142_p8 }
 0x18a   : > { %p1145_p0 = pnand %p1144_p10, %p1138_p13 }
 0x18c   : > { %1148 = shalt.err (!%p1145_p0)
}
 0x18d   : > { %917 = dma.vmem_to_hbm [thread:$0]  (%p1344_p11), %s1517_s6, 512, %s1524_s13, %s578_s8, %s1218_s9, %s1218_s9, %s1219_s11  }
 0x18e PF: > { %p938_p5 = scmp.ge.s32.totalorder %s1211_s20, 2  ;;  %s622_s29 = sand.u32 1, %s1191_s15  }
 0x18f   : > { %p1597_p9 = scmp.ne.s32.totalorder %s1587_s26, 0  ;;  %s623_s24 = scalar_lea.sflag [#allocation4], %s622_s29 }
 0x191   : > { %p929_p1 = pnand %p938_p5, %p1597_p9 }
 0x193   : > { %1182 = dma.done.wait (!%p929_p1), %s623_s24, 512  }
 0x194   : > { %1184 = vsyncadd (!%p929_p1), %s623_s24, 4294966784  ;;  %s632_s30 = scalar_lea.sflag [#allocation9], %s622_s29 }
 0x195   : > { %1186 = dma.done.wait (!%p929_p1), %s632_s30, 512  }
 0x196   : > { %1188 = vsyncadd (!%p929_p1), %s632_s30, 4294966784  ;;  %s25_s20 = sadd.s32 1, %s1211_s20   ;;  %s1598_s15 = smov %s1195_s16 }
 0x197   : > { %p22_p2 = scmp.ge.s32.totalorder %s25_s20, 8   ;;  %s1599_s16 = smov %s1199_s17 }
 0x198   : > { %s1600_s17 = smov %s1353_s10  ;;  %s1601_s18 = smov %s1207_s19 }
 0x199   : > { %s1602_s19 = smov %s1604_s5  ;;  %24 = sbr.rel (!%p22_p2) target bundleno = 9 (0x9), region = 99 }
 0x1a0   :  { %637 = vsyncpa [#allocation3], 1 }
 0x1a1   :  { %639 = vsyncpa [#allocation3 + $0x1], 1 }
 0x1a2   :  { %640 = vsyncpa [#allocation6], 1 }
 0x1a3   :  { %641 = vsyncpa [#allocation4], 1 }
 0x1a4   :  { %643 = vsyncpa [#allocation4 + $0x1], 1 }
 0x1a5   :  { %644 = vsyncpa [#allocation9], 1 }
 0x1a6   :  { %646 = vsyncpa [#allocation9 + $0x1], 1 }

</bundles_post_ra>
